<compile_context>
chip_gen: v5e
topology: v5e:2x2
jax: 0.10.0
libtpu: 0.0.40
codegen_flags: <defaults>
</compile_context>

<pallas_src>
import functools

import jax
import jax.numpy as jnp
from jax.experimental import pallas as pl
from jax.experimental.pallas import tpu as pltpu


def _stats_pool_kernel(x_ref, out_ref, sum_ref, sumsq_ref, *, inv_t, rem, eps):
    k = pl.program_id(1)
    nk = pl.num_programs(1)

    @pl.when(k == 0)
    def _init():
        sum_ref[...] = jnp.zeros_like(sum_ref)
        sumsq_ref[...] = jnp.zeros_like(sumsq_ref)

    x = x_ref[...].astype(jnp.float32)                       # (R, Tt)

    if rem:
        # Last T-block runs past the true sequence length: zero the padded
        # lanes so they do not contribute to sum / sum-of-squares.
        cols = jax.lax.broadcasted_iota(jnp.int32, x.shape, dimension=1)
        in_bounds = (k < nk - 1) | (cols < rem)
        x = jnp.where(in_bounds, x, 0.0)

    sum_ref[...] += jnp.sum(x, axis=-1, keepdims=True)       # (R, 1)
    sumsq_ref[...] += jnp.sum(x * x, axis=-1, keepdims=True)  # (R, 1)

    @pl.when(k == nk - 1)
    def _finalize():
        mean = sum_ref[...] * inv_t                           # (R, 1)
        var = jnp.maximum(sumsq_ref[...] * inv_t - mean * mean, eps)
        std = jnp.sqrt(var)                                   # (R, 1)
        out_ref[...] = jnp.concatenate([mean, std], axis=1).astype(out_ref.dtype)


def stats_pooling(x, *, eps=1e-12, row_tile=None, t_tile=None,
                  vmem_limit_bytes=48 * 1024 * 1024):
    """x: (B, C, T) -> (B, 2*C) = [mean | std], pooling over the last axis."""
    B, C, T = x.shape
    BC = B * C
    x2d = x.reshape(BC, T)
    itemsize = jnp.dtype(x.dtype).itemsize

    # ---- T tile (lane axis): take the full T when modest, else tile so VMEM
    # use is independent of T. ----
    if t_tile is None:
        max_row_bytes = 32 * 1024                       # per-row bytes before tiling T
        if T * itemsize <= max_row_bytes:
            t_tile = T
        else:
            t_tile = max_row_bytes // itemsize          # 8192 f32 / 16384 bf16 (mult of 128)
    t_tile = min(t_tile, T)
    if t_tile < T:
        assert t_tile % 128 == 0, "t_tile must be a multiple of 128 when tiling T"

    # ---- Row tile (sublane axis): target ~8 MiB input blocks (double-buffered
    # by the pipeline => ~16 MiB), multiple of 16 for f32/bf16 packing. ----
    if row_tile is None:
        target_block_bytes = 8 * 1024 * 1024
        row_tile = target_block_bytes // (t_tile * itemsize)
        row_tile = max(16, min(2048, (row_tile // 16) * 16))
    row_tile = min(row_tile, BC)
    if row_tile < BC:
        assert row_tile % 8 == 0, "row_tile must be a multiple of 8 when tiling rows"

    grid = (pl.cdiv(BC, row_tile), pl.cdiv(T, t_tile))

    kernel = functools.partial(
        _stats_pool_kernel,
        inv_t=1.0 / T,
        rem=T % t_tile,
        eps=eps,
    )

    out = pl.pallas_call(
        kernel,
        out_shape=jax.ShapeDtypeStruct((BC, 2), x.dtype),
        grid_spec=pltpu.PrefetchScalarGridSpec(
            num_scalar_prefetch=0,
            grid=grid,
            in_specs=[pl.BlockSpec((row_tile, t_tile), lambda i, k: (i, k))],
            out_specs=pl.BlockSpec((row_tile, 2), lambda i, k: (i, 0)),
            scratch_shapes=[
                pltpu.VMEM((row_tile, 1), jnp.float32),   # running sum
                pltpu.VMEM((row_tile, 1), jnp.float32),   # running sum of squares
            ],
        ),
        compiler_params=pltpu.CompilerParams(
            dimension_semantics=("parallel", "arbitrary"),
            vmem_limit_bytes=vmem_limit_bytes,
        ),
    )(x2d)

    # (BC, 2) -> (B, C, 2) -> (B, 2, C) -> (B, 2*C) == [means | stds]
    return jnp.swapaxes(out.reshape(B, C, 2), 1, 2).reshape(B, 2 * C)


def _reference(x, eps=1e-12):
    mean = jnp.mean(x, axis=-1, keepdims=True)
    var = jnp.mean((x - mean) ** 2, axis=-1)
    mean = jnp.squeeze(mean, axis=-1)
    var = jnp.where(var <= eps, eps, var)
    std = jnp.sqrt(var)
    return jnp.concatenate([mean, std], axis=-1)


if __name__ == "__main__":
    key = jax.random.PRNGKey(0)
    key1, key2 = jax.random.split(key)

    # Small shape implied by the module (B, C, T).
    B, C, T = 2, 4, 16
    x = jax.random.normal(key1, (B, C, T), dtype=jnp.float32)
    out = stats_pooling(x)
    jax.block_until_ready(out)
    ref = _reference(x)
    assert out.shape == (B, 2 * C), out.shape
    assert jnp.allclose(out, ref, atol=1e-5, rtol=1e-5), (out, ref)

    # Exercise the tiled path (multiple row blocks with a ragged row tail, and
    # T accumulation across grid steps with a masked ragged T tail).
    B2, C2, T2 = 3, 50, 300
    x2 = jax.random.normal(key2, (B2, C2, T2), dtype=jnp.float32) * 0.5 + 1.0
    out2 = stats_pooling(x2, row_tile=16, t_tile=128)
    jax.block_until_ready(out2)
    ref2 = _reference(x2)
    assert out2.shape == (B2, 2 * C2), out2.shape
    assert jnp.allclose(out2, ref2, atol=1e-4, rtol=1e-4), float(
        jnp.max(jnp.abs(out2 - ref2)))

    print("KERNEL_OK")
</pallas_src>

<mosaic_0001>
module attributes {stable_mosaic.version = 11 : i64} {
  func.func @_stats_pool_kernel(%arg0: i32, %arg1: i32, %arg2: memref<8x16xf32, #tpu.memory_space<vmem>>, %arg3: memref<8x2xf32, #tpu.memory_space<vmem>>, %arg4: memref<8x1xf32, #tpu.memory_space<vmem>>, %arg5: memref<8x1xf32, #tpu.memory_space<vmem>>) attributes {dimension_semantics = [#tpu.dimension_semantics<parallel>, #tpu.dimension_semantics<arbitrary>], iteration_bounds = array<i64: 1, 1>, scalar_prefetch = 0 : i64, scratch_operands = 2 : i64, tpu.core_type = #tpu.core_type<tc>, window_params = [{transform_indices = @transform_0, window_bounds = array<i64: 8, 16>}, {transform_indices = @transform_1, window_bounds = array<i64: 8, 2>}]} {
    %c0_i32 = arith.constant 0 : i32
    %0 = arith.cmpi eq, %arg1, %c0_i32 : i32
    %1 = arith.extui %0 : i1 to i32
    %c0_i32_0 = arith.constant 0 : i32
    %2 = arith.cmpi ne, %1, %c0_i32_0 : i32
    scf.if %2 {
      %cst_13 = arith.constant 0.000000e+00 : f32
      %18 = vector.broadcast %cst_13 : f32 to vector<8x1xf32>
      %c0_14 = arith.constant 0 : index
      %c0_15 = arith.constant 0 : index
      %19 = vector.load %arg4[%c0_14, %c0_15] : memref<8x1xf32, #tpu.memory_space<vmem>>, vector<8x1xf32>
      tpu.vector_store %arg4[%c0_14, %c0_15], %18 {strides = array<i32>} : memref<8x1xf32, #tpu.memory_space<vmem>>, vector<8x1xf32>,
      %cst_16 = arith.constant 0.000000e+00 : f32
      %20 = vector.broadcast %cst_16 : f32 to vector<8x1xf32>
      %c0_17 = arith.constant 0 : index
      %c0_18 = arith.constant 0 : index
      %21 = vector.load %arg5[%c0_17, %c0_18] : memref<8x1xf32, #tpu.memory_space<vmem>>, vector<8x1xf32>
      tpu.vector_store %arg5[%c0_17, %c0_18], %20 {strides = array<i32>} : memref<8x1xf32, #tpu.memory_space<vmem>>, vector<8x1xf32>,
    } else {
    }
    %c0 = arith.constant 0 : index
    %c0_1 = arith.constant 0 : index
    %3 = vector.load %arg2[%c0, %c0_1] : memref<8x16xf32, #tpu.memory_space<vmem>>, vector<8x16xf32>
    %c0_2 = arith.constant 0 : index
    %c0_3 = arith.constant 0 : index
    %4 = vector.load %arg4[%c0_2, %c0_3] : memref<8x1xf32, #tpu.memory_space<vmem>>, vector<8x1xf32>
    %cst = arith.constant dense<0.000000e+00> : vector<8xf32>
    %5 = vector.multi_reduction <add>, %3, %cst [1] : vector<8x16xf32> to vector<8xf32>
    %6 = vector.shape_cast %5 : vector<8xf32> to vector<8x1xf32>
    %7 = arith.addf %4, %6 : vector<8x1xf32>
    %c0_4 = arith.constant 0 : index
    %c0_5 = arith.constant 0 : index
    %8 = vector.load %arg4[%c0_4, %c0_5] : memref<8x1xf32, #tpu.memory_space<vmem>>, vector<8x1xf32>
    tpu.vector_store %arg4[%c0_4, %c0_5], %7 {strides = array<i32>} : memref<8x1xf32, #tpu.memory_space<vmem>>, vector<8x1xf32>,
    %c0_6 = arith.constant 0 : index
    %c0_7 = arith.constant 0 : index
    %9 = vector.load %arg5[%c0_6, %c0_7] : memref<8x1xf32, #tpu.memory_space<vmem>>, vector<8x1xf32>
    %10 = arith.mulf %3, %3 : vector<8x16xf32>
    %cst_8 = arith.constant dense<0.000000e+00> : vector<8xf32>
    %11 = vector.multi_reduction <add>, %10, %cst_8 [1] : vector<8x16xf32> to vector<8xf32>
    %12 = vector.shape_cast %11 : vector<8xf32> to vector<8x1xf32>
    %13 = arith.addf %9, %12 : vector<8x1xf32>
    %c0_9 = arith.constant 0 : index
    %c0_10 = arith.constant 0 : index
    %14 = vector.load %arg5[%c0_9, %c0_10] : memref<8x1xf32, #tpu.memory_space<vmem>>, vector<8x1xf32>
    tpu.vector_store %arg5[%c0_9, %c0_10], %13 {strides = array<i32>} : memref<8x1xf32, #tpu.memory_space<vmem>>, vector<8x1xf32>,
    %c0_i32_11 = arith.constant 0 : i32
    %15 = arith.cmpi eq, %arg1, %c0_i32_11 : i32
    %16 = arith.extui %15 : i1 to i32
    %c0_i32_12 = arith.constant 0 : i32
    %17 = arith.cmpi ne, %16, %c0_i32_12 : i32
    scf.if %17 {
      %c0_13 = arith.constant 0 : index
      %c0_14 = arith.constant 0 : index
      %18 = vector.load %arg4[%c0_13, %c0_14] : memref<8x1xf32, #tpu.memory_space<vmem>>, vector<8x1xf32>
      %cst_15 = arith.constant 6.250000e-02 : f32
      %19 = vector.broadcast %cst_15 : f32 to vector<8x1xf32>
      %20 = arith.mulf %18, %19 : vector<8x1xf32>
      %c0_16 = arith.constant 0 : index
      %c0_17 = arith.constant 0 : index
      %21 = vector.load %arg5[%c0_16, %c0_17] : memref<8x1xf32, #tpu.memory_space<vmem>>, vector<8x1xf32>
      %cst_18 = arith.constant 6.250000e-02 : f32
      %22 = vector.broadcast %cst_18 : f32 to vector<8x1xf32>
      %23 = arith.mulf %21, %22 : vector<8x1xf32>
      %24 = arith.mulf %20, %20 : vector<8x1xf32>
      %25 = arith.subf %23, %24 : vector<8x1xf32>
      %cst_19 = arith.constant 9.99999996E-13 : f32
      %26 = vector.broadcast %cst_19 : f32 to vector<8x1xf32>
      %27 = arith.maximumf %25, %26 : vector<8x1xf32>
      %28 = math.sqrt %27 : vector<8x1xf32>
      %29 = tpu.concatenate %20, %28 in 1 : vector<8x1xf32>, vector<8x1xf32> -> vector<8x2xf32>
      %c0_20 = arith.constant 0 : index
      %c0_21 = arith.constant 0 : index
      %30 = vector.load %arg3[%c0_20, %c0_21] : memref<8x2xf32, #tpu.memory_space<vmem>>, vector<8x2xf32>
      tpu.vector_store %arg3[%c0_20, %c0_21], %29 {strides = array<i32>} : memref<8x2xf32, #tpu.memory_space<vmem>>, vector<8x2xf32>,
    } else {
    }
    return
  }
  func.func @transform_0(%arg0: i32, %arg1: i32) -> (i32, i32) {
    %c0_i32 = arith.constant 0 : i32
    return %arg0, %arg1 : i32, i32
  }
  func.func @transform_1(%arg0: i32, %arg1: i32) -> (i32, i32) {
    %c0_i32 = arith.constant 0 : i32
    %c0_i32_0 = arith.constant 0 : i32
    return %arg0, %c0_i32 : i32, i32
  }
}

</mosaic_0001>

<bundles_post_ra>
// kernel: tpu_custom_call.1
= control target key start
LH: loop header
LB: loop body
LE: loop exit
PB: predicated region body
PF: predicated region fallthrough
CT: control target
= control target key end

     0   :  { %6 = vsyncpa [#allocation5], 0  ;;  %s110_s9 = smov [#allocation4]   ;;  %s134_s0 = inlined_call_operand.hbm [shape: f32[8,16], index: 0, kind: input, shape index: {}]   ;;  %s135_s1 = inlined_call_operand.vmem [shape: f32[8,2], index: 1, kind: output, shape index: {}]  }
   0x1   :  { %s12_s8 = sshll.u32 %s134_s0, 4  ;;  %s14_s10 = sshll.u32 %s110_s9, 4  ;;  %s13_s8 = int_to_ptr.hbm [resolvable:$true] %s12_s8  ;;  %s15_s10 = int_to_ptr.vmem [resolvable:$true] %s14_s10 }
   0x2   :  { %17 = dma.hbm_to_vmem [thread:$0]  %s13_s8, 128, %s15_s10, [#allocation5]  }
   0x3   :  { %108 = dma.done.wait [#allocation5], 128  }
   0x4   :  { %109 = vsyncadd [#allocation5], 4294967168  ;;  %vm26_vm0 = vcmask 7168   ;;  %v111_v0 = vmov 0.0   ;;  %vm31_vm1 = vcmask 130048   ;;  %v29_v1 = vld [vmem:[#allocation4] sm:$0xff] }
   0x5   :  { %27 = vst.msk [vmem:[#allocation2] sm:$0xff] %vm26_vm0, %v111_v0  ;;  %v32_v2 = vsel %vm31_vm1, %v29_v1, 0.0  ;;  %v39_v3 = vmul.f32 %v29_v1, %v29_v1  ;;  %s112_s0 = smov 1   ;;  %vm72_vm4 = vcmask 15360  }
   0x6   :  { %28 = vst.msk [vmem:[#allocation3] sm:$0xff] %vm26_vm0, %v111_v0  ;;  %33 = vadd.xlane.f32.xlu0 %v32_v2 }
   0x7   :  { %v40_v4 = vsel %vm31_vm1, %v39_v3, 0.0 }
   0xc   :  { %v30_v5 = vld [vmem:[#allocation2] sm:$0xff] }
   0xd   :  { %v38_v8 = vld [vmem:[#allocation3] sm:$0xff] }
   0xe   :  { %41 = vadd.xlane.f32.xlu0 %v40_v4 }
  0x79   :  { %v34_v6 = vpop.xlane.xlu0 %33 }
  0x7a   :  { %v35_v7 = vadd.f32 %v34_v6, %v30_v5 }
  0x7c   :  { %37 = vst.msk [vmem:[#allocation2] sm:$0xff] %vm26_vm0, %v35_v7 }
  0x81   :  { %v42_v9 = vpop.xlane.xlu0 %41 }
  0x82   :  { %v43_v10 = vadd.f32 %v42_v9, %v38_v8 }
  0x83   :  { %v48_v11 = vld [vmem:[#allocation2] sm:$0xff] }
  0x84   :  { %44 = vst.msk [vmem:[#allocation3] sm:$0xff] %vm26_vm0, %v43_v10  ;;  %v49_v12 = vmul.f32 0.0625, %v48_v11 }
  0x86   :  { %v52_v15 = vmul.f32 %v49_v12, %v49_v12 }
  0x8b   :  { %v50_v13 = vld [vmem:[#allocation3] sm:$0xff] }
  0x8c   :  { %v51_v14 = vmul.f32 0.0625, %v50_v13 }
  0x8e   :  { %v53_v16 = vsub.f32 %v51_v14, %v52_v15 }
  0x90   :  { %v54_v17 = vmax.f32 %v53_v16, 1e-12 }
  0x92   :  { %82 = vrsqrt.f32 %v54_v17  ;;  %vm62_vm2 = vcmp.eq.f32.partialorder %v54_v17, inf  ;;  %v65_v25 = vand.u32 2147483648, %v54_v17  ;;  %vm64_vm3 = vcmp.eq.f32.partialorder %v54_v17, 0.0 }
  0x98   :  { %v83_v18 = vpop.eup %82 }
  0x99   :  { %v56_v19 = vmul.f32 %v83_v18, %v54_v17 }
  0x9b   :  { %v57_v20 = vmul.f32 %v83_v18, %v56_v19 }
  0x9d   :  { %v58_v21 = vmul.f32 0.5, %v57_v20 }
  0x9f   :  { %v59_v22 = vsub.f32 1.5, %v58_v21 }
  0xa1   :  { %v60_v23 = vmul.f32 %v83_v18, %v59_v22 }
  0xa3   :  { %v61_v24 = vmul.f32 %v60_v23, %v54_v17 }
  0xa5   :  { %v63_v26 = vsel %vm62_vm2, %v54_v17, %v61_v24 }
  0xa6   :  { %v66_v27 = vsel %vm64_vm3, %v65_v25, %v63_v26 }
  0xa7   :  { %68 = vrot.lane.b32.xlu1 %v66_v27, %s112_s0 }
 0x119   :  { %v69_v28 = vpop.permute.xlu1 %68 }
 0x11a   :  { %v71_v29 = vsel %vm26_vm0, %v49_v12, %v69_v28 }
 0x11b   :  { %73 = vst.msk [vmem:[%s135_s1] sm:$0xff] %vm72_vm4, %v71_v29 }
 0x11c   :  { %78 = vsyncpa [#allocation5], 1 }

</bundles_post_ra>
